<compile_context>
chip_gen: v7x
topology: tpu7x:2x2x1
jax: 0.10.0
libtpu: 0.0.40
codegen_flags: <defaults>
</compile_context>

<pallas_src>
import math

import jax
import jax.numpy as jnp
import numpy as np
from jax.experimental import pallas as pl
from jax.experimental.pallas import tpu as pltpu

NUM_OPS = 3  # ['AND', 'OR', 'NOT']
LANE = 128


def _pick_tn(D):
    """Column tile for the result_decoder weight.  Tiling only kicks in when D
    is a lane multiple and large enough that a resident (D+3, D) Wd would
    pressure v7x's 64 MiB VMEM; otherwise use the full width (single pass)."""
    if D % LANE == 0 and D > 512:
        for tn in (512, 256, 128):
            if D % tn == 0:
                return tn
    return D


def _pick_block_batch(B, S, D, W, TN, itemsize, target_rows=256, vmem_budget=40 << 20):
    """Largest divisor TB of B such that the (TB*S)-row block fills the MXU
    M-dim (>= target_rows) while (a) the rough per-block VMEM footprint stays
    under `vmem_budget` (sized for v7x's 64 MiB/TC) and (b) at least 2 grid
    steps remain whenever B >= 2 so the 'parallel' batch axis can feed both
    v7x TensorCores."""
    # per-row footprint: double-buffered x + out slabs plus ~8 live f32 temps.
    per_row = 2 * D * itemsize + 2 * TN * itemsize + 8 * W * 4
    max_rows = max(S, vmem_budget // max(per_row, 1))
    best = 1
    for cand in range(1, B + 1):
        if B % cand:
            continue
        if cand * S > max_rows:
            break
        if B // cand < min(2, B):   # keep >= 2 grid steps when B >= 2 (v7x)
            continue
        best = cand
        if cand * S >= target_rows:
            break
    return best


def _vmem_limit_bytes(TB, S, D, W, TN, itemsize):
    """Rough VMEM budget: double-buffered weights/blocks + f32 intermediates +
    the logical scratch, with 2x headroom, clamped to [32 MiB, 0.75 * cap]."""
    weights = 2 * (D * W + W) * itemsize + 2 * (W * TN + TN) * itemsize
    blocks = 2 * TB * S * (D + TN) * itemsize          # pipelined x / out blocks
    scratch = TB * S * W * 4                           # logical scratch (f32)
    interm = 8 * TB * S * W * 4                        # f32 temporaries (upper bound)
    est = weights + blocks + scratch + interm
    try:
        cap = pltpu.get_tpu_info().vmem_capacity_bytes  # 64 MiB/TC v7x; 128 MiB v5e/v6e
    except Exception:
        cap = 64 * 1024 * 1024
    return int(min(max(2 * est, 32 * 1024 * 1024), (3 * cap) // 4))


def _seq_product(a):
    """prod over axis=1 of (TB, S, W) -> (TB, 1, W) as a pairwise multiply tree
    (pure VPU ops; avoids relying on a multiplicative-reduce lowering)."""
    while a.shape[1] > 1:
        s = a.shape[1]
        half = s // 2
        lo = a[:, :half, :]
        hi = a[:, half:2 * half, :]
        rem = a[:, 2 * half:, :]          # empty, or (TB, 1, W) when s is odd
        a = lo * hi
        if s % 2:                         # carry the leftover row to next round
            a = jnp.concatenate([a, rem], axis=1)
    return a


def _slu_kernel(x_ref, wpc_ref, bpc_ref, wd_ref, bd_ref, o_ref, logical_ref):
    n = pl.program_id(1)
    TB, S, D = x_ref.shape
    W = wpc_ref.shape[-1]                 # D + NUM_OPS
    rows = TB * S

    # Phase 1 (n == 0): one fused MXU pass for proposition_encoder +
    # logic_controller, fuzzy-logic mixing; result cached in VMEM scratch and
    # reused for every result_decoder column tile of this batch block.
    @pl.when(n == 0)
    def _():
        x2 = x_ref[...].reshape(rows, D)
        h = (jnp.dot(x2, wpc_ref[...], preferred_element_type=jnp.float32)
             + bpc_ref[...])                                     # (rows, W) f32

        # Sigmoid over the full fused width; columns [D:D+3] hold controller
        # logits (meaningless as propositions) but the matching zero rows of
        # Wd kill their contribution exactly.
        props = 1.0 / (1.0 + jnp.exp(-h))
        props3 = props.reshape(TB, S, W)

        # 3-way softmax on a single (rows, 3) stream.
        lc = h[:, D:D + NUM_OPS]
        m = jnp.max(lc, axis=-1, keepdims=True)
        e = jnp.exp(lc - m)
        inv = pl.reciprocal(jnp.sum(e, axis=-1, keepdims=True), approx=False)
        w3 = (e * inv).reshape(TB, S, NUM_OPS)

        # Fuzzy logic ops. AND/OR are global products over the full sequence
        # axis, so S must fit inside one block. If S ever outgrows a block,
        # restructure as a running-product accumulator over an 'arbitrary' S
        # axis (and consider log-space accumulation to avoid underflow).
        and_res = _seq_product(props3)                           # (TB, 1, W)
        or_res = 1.0 - _seq_product(1.0 - props3)                # (TB, 1, W)
        not_res = 1.0 - props3                                   # (TB, S, W)

        logical = (w3[..., 0:1] * and_res
                   + w3[..., 1:2] * or_res
                   + w3[..., 2:3] * not_res)                     # (TB, S, W) f32
        logical_ref[...] = logical.reshape(rows, W)

    # Phase 2 (every n): result_decoder column tile (f32 accumulation).
    y = (jnp.dot(logical_ref[...].astype(wd_ref.dtype), wd_ref[...],
                 preferred_element_type=jnp.float32)
         + bd_ref[...])
    o_ref[...] = y.reshape(o_ref.shape).astype(o_ref.dtype)


def prepare_params(wp, bp, wc, bc, wd, bd):
    """One-time weight fusion (hoisted out of the per-call path).
    wpc[:, :D] = Wp and wpc[:, D:D+3] = Wc, so the fused first matmul is
    exactly ceil((D+3)/128) MXU N-tiles wide.  Wd gets 3 zero rows so the
    controller-logit columns of `logical` contribute nothing."""
    wpc = jnp.concatenate([wp, wc], axis=1)            # (D, D+3)
    bpc = jnp.concatenate([bp, bc], axis=1)            # (1, D+3)
    wd_p = jnp.pad(wd, ((0, NUM_OPS), (0, 0)))         # (D+3, D)
    return wpc, bpc, wd_p, bd


def symbolic_logic_unit_fused(x, wpc, bpc, wd_p, bd):
    """Pallas forward for SymbolicLogicUnit on pre-fused params. x: (B, S, D)."""
    B, S, D = x.shape
    W = wpc.shape[-1]
    assert W == D + NUM_OPS, "params must come from prepare_params()"
    TN = _pick_tn(D)
    itemsize = jnp.dtype(x.dtype).itemsize
    TB = _pick_block_batch(B, S, D, W, TN, itemsize)
    grid = (B // TB, D // TN)

    cost = pl.CostEstimate(
        flops=int(4 * B * S * D * W + 12 * B * S * W),
        transcendentals=int(B * S * (W + NUM_OPS)),
        bytes_accessed=int(2 * B * S * D * itemsize
                           + (wpc.size + bpc.size + wd_p.size + bd.size) * itemsize),
    )

    return pl.pallas_call(
        _slu_kernel,
        out_shape=jax.ShapeDtypeStruct((B, S, D), x.dtype),
        grid_spec=pltpu.PrefetchScalarGridSpec(
            num_scalar_prefetch=0,
            grid=grid,
            in_specs=[
                pl.BlockSpec((TB, S, D), lambda b, n: (b, 0, 0)),  # x (constant over n)
                pl.BlockSpec((D, W), lambda b, n: (0, 0)),         # fused [Wp | Wc]
                pl.BlockSpec((1, W), lambda b, n: (0, 0)),         # fused [bp | bc]
                pl.BlockSpec((W, TN), lambda b, n: (0, n)),        # Wd column tile
                pl.BlockSpec((1, TN), lambda b, n: (0, n)),        # bd column tile
            ],
            out_specs=pl.BlockSpec((TB, S, TN), lambda b, n: (b, 0, n)),
            scratch_shapes=[pltpu.VMEM((TB * S, W), jnp.float32)],  # logical cache
        ),
        compiler_params=pltpu.CompilerParams(
            dimension_semantics=("parallel", "arbitrary"),
            vmem_limit_bytes=_vmem_limit_bytes(TB, S, D, W, TN, itemsize),
        ),
        cost_estimate=cost,
    )(x, wpc, bpc, wd_p, bd)


def symbolic_logic_unit(x, wp, bp, wc, bc, wd, bd):
    """Convenience wrapper: fuse params then run the kernel."""
    return symbolic_logic_unit_fused(x, *prepare_params(wp, bp, wc, bc, wd, bd))


def _reference(x, wp, bp, wc, bc, wd, bd):
    """Pure-JAX reference mirroring the PyTorch forward."""
    props = jax.nn.sigmoid(x @ wp + bp[0])                       # (B, S, D)
    w = jax.nn.softmax(x @ wc + bc[0], axis=-1)                  # (B, S, 3)
    and_res = jnp.prod(props, axis=1, keepdims=True)             # (B, 1, D)
    or_res = 1.0 - jnp.prod(1.0 - props, axis=1, keepdims=True)  # (B, 1, D)
    not_res = 1.0 - props                                        # (B, S, D)
    logical = (w[..., 0:1] * and_res + w[..., 1:2] * or_res + w[..., 2:3] * not_res)
    return logical @ wd + bd[0]


def _init_linear(key, fan_in, fan_out):
    """Deterministic nn.Linear-style init: U(-1/sqrt(fan_in), 1/sqrt(fan_in))."""
    kw, kb = jax.random.split(key)
    bound = 1.0 / math.sqrt(fan_in)
    w = jax.random.uniform(kw, (fan_in, fan_out), jnp.float32, -bound, bound)
    b = jax.random.uniform(kb, (1, fan_out), jnp.float32, -bound, bound)
    return w, b


if __name__ == "__main__":
    B, S, D = 2, 8, 32  # batch, seq, d_model

    root = jax.random.PRNGKey(0)
    kx, kp, kc, kd = jax.random.split(root, 4)

    x = jax.random.normal(kx, (B, S, D), jnp.float32)
    wp, bp = _init_linear(kp, D, D)          # proposition_encoder
    wc, bc = _init_linear(kc, D, NUM_OPS)    # logic_controller
    wd, bd = _init_linear(kd, D, D)          # result_decoder

    params = prepare_params(wp, bp, wc, bc, wd, bd)   # one-time fusion
    out = symbolic_logic_unit_fused(x, *params)
    out = jax.block_until_ready(out)

    ref = _reference(x, wp, bp, wc, bc, wd, bd)
    # Both paths are f32 with f32 accumulation; tolerance covers MXU vs XLA
    # default-precision matmul rounding differences.
    np.testing.assert_allclose(np.asarray(out), np.asarray(ref), rtol=5e-3, atol=5e-3)

    print("KERNEL_OK")
</pallas_src>

<mosaic_0001>
module attributes {stable_mosaic.version = 11 : i64} {
  func.func @_slu_kernel(%arg0: i32, %arg1: i32, %arg2: memref<1x8x32xf32, #tpu.memory_space<vmem>>, %arg3: memref<32x35xf32, #tpu.memory_space<vmem>>, %arg4: memref<1x35xf32, #tpu.memory_space<vmem>>, %arg5: memref<35x32xf32, #tpu.memory_space<vmem>>, %arg6: memref<1x32xf32, #tpu.memory_space<vmem>>, %arg7: memref<1x8x32xf32, #tpu.memory_space<vmem>>, %arg8: memref<8x35xf32, #tpu.memory_space<vmem>>) attributes {dimension_semantics = [#tpu.dimension_semantics<parallel>, #tpu.dimension_semantics<arbitrary>], iteration_bounds = array<i64: 2, 1>, scalar_prefetch = 0 : i64, scratch_operands = 1 : i64, tpu.core_type = #tpu.core_type<tc>, window_params = [{transform_indices = @transform_0, window_bounds = array<i64: 1, 8, 32>}, {pipeline_mode = #tpu.pipeline_mode<synchronous>, transform_indices = @transform_1, window_bounds = array<i64: 32, 35>}, {pipeline_mode = #tpu.pipeline_mode<synchronous>, transform_indices = @transform_2, window_bounds = array<i64: 1, 35>}, {transform_indices = @transform_3, window_bounds = array<i64: 35, 32>}, {transform_indices = @transform_4, window_bounds = array<i64: 1, 32>}, {transform_indices = @transform_5, window_bounds = array<i64: 1, 8, 32>}]} {
    %c0_i32 = arith.constant 0 : i32
    %0 = arith.cmpi eq, %arg1, %c0_i32 : i32
    %1 = arith.extui %0 : i1 to i32
    %c0_i32_0 = arith.constant 0 : i32
    %2 = arith.cmpi ne, %1, %c0_i32_0 : i32
    scf.if %2 {
      %c0_9 = arith.constant 0 : index
      %c0_10 = arith.constant 0 : index
      %c0_11 = arith.constant 0 : index
      %11 = vector.load %arg2[%c0_9, %c0_10, %c0_11] : memref<1x8x32xf32, #tpu.memory_space<vmem>>, vector<1x8x32xf32>
      %12 = vector.shape_cast %11 : vector<1x8x32xf32> to vector<8x32xf32>
      %c0_12 = arith.constant 0 : index
      %c0_13 = arith.constant 0 : index
      %13 = vector.load %arg3[%c0_12, %c0_13] : memref<32x35xf32, #tpu.memory_space<vmem>>, vector<32x35xf32>
      %cst_14 = arith.constant dense<0.000000e+00> : vector<8x35xf32>
      %14 = tpu.matmul %12, %13, %cst_14 {dimension_numbers = #tpu.dot_dimension_numbers<[1], [0], [0], [1], [0, 0, 1, 1], [], []>} : vector<8x32xf32>, vector<32x35xf32>, vector<8x35xf32> -> vector<8x35xf32>
      %c0_15 = arith.constant 0 : index
      %c0_16 = arith.constant 0 : index
      %15 = vector.load %arg4[%c0_15, %c0_16] : memref<1x35xf32, #tpu.memory_space<vmem>>, vector<1x35xf32>
      %16 = vector.broadcast %15 : vector<1x35xf32> to vector<8x35xf32>
      %17 = arith.addf %14, %16 : vector<8x35xf32>
      %cst_17 = arith.constant 0.000000e+00 : f32
      %18 = vector.broadcast %cst_17 : f32 to vector<8x35xf32>
      %19 = arith.subf %18, %17 : vector<8x35xf32>
      %20 = math.exp %19 : vector<8x35xf32>
      %cst_18 = arith.constant 1.000000e+00 : f32
      %21 = vector.broadcast %cst_18 : f32 to vector<8x35xf32>
      %22 = arith.addf %21, %20 : vector<8x35xf32>
      %cst_19 = arith.constant 1.000000e+00 : f32
      %23 = vector.broadcast %cst_19 : f32 to vector<8x35xf32>
      %24 = arith.divf %23, %22 : vector<8x35xf32>
      %25 = vector.shape_cast %24 : vector<8x35xf32> to vector<1x8x35xf32>
      %26 = vector.extract_strided_slice %17 {offsets = [0, 32], sizes = [8, 3], strides = [1, 1]} : vector<8x35xf32> to vector<8x3xf32>
      %cst_20 = arith.constant dense<0xFF800000> : vector<8xf32>
      %27 = vector.multi_reduction <maximumf>, %26, %cst_20 [1] : vector<8x3xf32> to vector<8xf32>
      %28 = vector.shape_cast %27 : vector<8xf32> to vector<8x1xf32>
      %29 = vector.broadcast %28 : vector<8x1xf32> to vector<8x3xf32>
      %30 = arith.subf %26, %29 : vector<8x3xf32>
      %31 = math.exp %30 : vector<8x3xf32>
      %cst_21 = arith.constant dense<0.000000e+00> : vector<8xf32>
      %32 = vector.multi_reduction <add>, %31, %cst_21 [1] : vector<8x3xf32> to vector<8xf32>
      %33 = vector.shape_cast %32 : vector<8xf32> to vector<8x1xf32>
      %34 = tpu.reciprocal %33 : vector<8x1xf32> -> vector<8x1xf32>
      %35 = vector.broadcast %34 : vector<8x1xf32> to vector<8x3xf32>
      %36 = arith.mulf %31, %35 : vector<8x3xf32>
      %37 = vector.shape_cast %36 : vector<8x3xf32> to vector<1x8x3xf32>
      %38 = vector.extract_strided_slice %25 {offsets = [0, 0, 0], sizes = [1, 4, 35], strides = [1, 1, 1]} : vector<1x8x35xf32> to vector<1x4x35xf32>
      %39 = vector.extract_strided_slice %25 {offsets = [0, 4, 0], sizes = [1, 4, 35], strides = [1, 1, 1]} : vector<1x8x35xf32> to vector<1x4x35xf32>
      %40 = arith.mulf %38, %39 : vector<1x4x35xf32>
      %41 = vector.extract_strided_slice %40 {offsets = [0, 0, 0], sizes = [1, 2, 35], strides = [1, 1, 1]} : vector<1x4x35xf32> to vector<1x2x35xf32>
      %42 = vector.extract_strided_slice %40 {offsets = [0, 2, 0], sizes = [1, 2, 35], strides = [1, 1, 1]} : vector<1x4x35xf32> to vector<1x2x35xf32>
      %43 = arith.mulf %41, %42 : vector<1x2x35xf32>
      %44 = vector.extract_strided_slice %43 {offsets = [0, 0, 0], sizes = [1, 1, 35], strides = [1, 1, 1]} : vector<1x2x35xf32> to vector<1x1x35xf32>
      %45 = vector.extract_strided_slice %43 {offsets = [0, 1, 0], sizes = [1, 1, 35], strides = [1, 1, 1]} : vector<1x2x35xf32> to vector<1x1x35xf32>
      %46 = arith.mulf %44, %45 : vector<1x1x35xf32>
      %cst_22 = arith.constant 1.000000e+00 : f32
      %47 = vector.broadcast %cst_22 : f32 to vector<1x8x35xf32>
      %48 = arith.subf %47, %25 : vector<1x8x35xf32>
      %49 = vector.extract_strided_slice %48 {offsets = [0, 0, 0], sizes = [1, 4, 35], strides = [1, 1, 1]} : vector<1x8x35xf32> to vector<1x4x35xf32>
      %50 = vector.extract_strided_slice %48 {offsets = [0, 4, 0], sizes = [1, 4, 35], strides = [1, 1, 1]} : vector<1x8x35xf32> to vector<1x4x35xf32>
      %51 = arith.mulf %49, %50 : vector<1x4x35xf32>
      %52 = vector.extract_strided_slice %51 {offsets = [0, 0, 0], sizes = [1, 2, 35], strides = [1, 1, 1]} : vector<1x4x35xf32> to vector<1x2x35xf32>
      %53 = vector.extract_strided_slice %51 {offsets = [0, 2, 0], sizes = [1, 2, 35], strides = [1, 1, 1]} : vector<1x4x35xf32> to vector<1x2x35xf32>
      %54 = arith.mulf %52, %53 : vector<1x2x35xf32>
      %55 = vector.extract_strided_slice %54 {offsets = [0, 0, 0], sizes = [1, 1, 35], strides = [1, 1, 1]} : vector<1x2x35xf32> to vector<1x1x35xf32>
      %56 = vector.extract_strided_slice %54 {offsets = [0, 1, 0], sizes = [1, 1, 35], strides = [1, 1, 1]} : vector<1x2x35xf32> to vector<1x1x35xf32>
      %57 = arith.mulf %55, %56 : vector<1x1x35xf32>
      %cst_23 = arith.constant 1.000000e+00 : f32
      %58 = vector.broadcast %cst_23 : f32 to vector<1x1x35xf32>
      %59 = arith.subf %58, %57 : vector<1x1x35xf32>
      %cst_24 = arith.constant 1.000000e+00 : f32
      %60 = vector.broadcast %cst_24 : f32 to vector<1x8x35xf32>
      %61 = arith.subf %60, %25 : vector<1x8x35xf32>
      %62 = vector.extract_strided_slice %37 {offsets = [0, 0, 0], sizes = [1, 8, 1], strides = [1, 1, 1]} : vector<1x8x3xf32> to vector<1x8x1xf32>
      %63 = vector.broadcast %62 : vector<1x8x1xf32> to vector<1x8x35xf32>
      %64 = vector.broadcast %46 : vector<1x1x35xf32> to vector<1x8x35xf32>
      %65 = arith.mulf %63, %64 : vector<1x8x35xf32>
      %66 = vector.extract_strided_slice %37 {offsets = [0, 0, 1], sizes = [1, 8, 1], strides = [1, 1, 1]} : vector<1x8x3xf32> to vector<1x8x1xf32>
      %67 = vector.broadcast %66 : vector<1x8x1xf32> to vector<1x8x35xf32>
      %68 = vector.broadcast %59 : vector<1x1x35xf32> to vector<1x8x35xf32>
      %69 = arith.mulf %67, %68 : vector<1x8x35xf32>
      %70 = arith.addf %65, %69 : vector<1x8x35xf32>
      %71 = vector.extract_strided_slice %37 {offsets = [0, 0, 2], sizes = [1, 8, 1], strides = [1, 1, 1]} : vector<1x8x3xf32> to vector<1x8x1xf32>
      %72 = vector.broadcast %71 : vector<1x8x1xf32> to vector<1x8x35xf32>
      %73 = arith.mulf %72, %61 : vector<1x8x35xf32>
      %74 = arith.addf %70, %73 : vector<1x8x35xf32>
      %75 = vector.shape_cast %74 : vector<1x8x35xf32> to vector<8x35xf32>
      %c0_25 = arith.constant 0 : index
      %c0_26 = arith.constant 0 : index
      %76 = vector.load %arg8[%c0_25, %c0_26] : memref<8x35xf32, #tpu.memory_space<vmem>>, vector<8x35xf32>
      tpu.vector_store %arg8[%c0_25, %c0_26], %75 {strides = array<i32>} : memref<8x35xf32, #tpu.memory_space<vmem>>, vector<8x35xf32>,
    } else {
    }
    %c0 = arith.constant 0 : index
    %c0_1 = arith.constant 0 : index
    %3 = vector.load %arg8[%c0, %c0_1] : memref<8x35xf32, #tpu.memory_space<vmem>>, vector<8x35xf32>
    %c0_2 = arith.constant 0 : index
    %c0_3 = arith.constant 0 : index
    %4 = vector.load %arg5[%c0_2, %c0_3] : memref<35x32xf32, #tpu.memory_space<vmem>>, vector<35x32xf32>
    %cst = arith.constant dense<0.000000e+00> : vector<8x32xf32>
    %5 = tpu.matmul %3, %4, %cst {dimension_numbers = #tpu.dot_dimension_numbers<[1], [0], [0], [1], [0, 0, 1, 1], [], []>} : vector<8x35xf32>, vector<35x32xf32>, vector<8x32xf32> -> vector<8x32xf32>
    %c0_4 = arith.constant 0 : index
    %c0_5 = arith.constant 0 : index
    %6 = vector.load %arg6[%c0_4, %c0_5] : memref<1x32xf32, #tpu.memory_space<vmem>>, vector<1x32xf32>
    %7 = vector.broadcast %6 : vector<1x32xf32> to vector<8x32xf32>
    %8 = arith.addf %5, %7 : vector<8x32xf32>
    %9 = vector.shape_cast %8 : vector<8x32xf32> to vector<1x8x32xf32>
    %c0_6 = arith.constant 0 : index
    %c0_7 = arith.constant 0 : index
    %c0_8 = arith.constant 0 : index
    %10 = vector.load %arg7[%c0_6, %c0_7, %c0_8] : memref<1x8x32xf32, #tpu.memory_space<vmem>>, vector<1x8x32xf32>
    tpu.vector_store %arg7[%c0_6, %c0_7, %c0_8], %9 {strides = array<i32>} : memref<1x8x32xf32, #tpu.memory_space<vmem>>, vector<1x8x32xf32>,
    return
  }
  func.func @transform_0(%arg0: i32, %arg1: i32) -> (i32, i32, i32) {
    %c0_i32 = arith.constant 0 : i32
    %c0_i32_0 = arith.constant 0 : i32
    %c0_i32_1 = arith.constant 0 : i32
    return %arg0, %c0_i32, %c0_i32_0 : i32, i32, i32
  }
  func.func @transform_1(%arg0: i32, %arg1: i32) -> (i32, i32) {
    %c0_i32 = arith.constant 0 : i32
    %c0_i32_0 = arith.constant 0 : i32
    %c0_i32_1 = arith.constant 0 : i32
    return %c0_i32, %c0_i32_0 : i32, i32
  }
  func.func @transform_2(%arg0: i32, %arg1: i32) -> (i32, i32) {
    %c0_i32 = arith.constant 0 : i32
    %c0_i32_0 = arith.constant 0 : i32
    %c0_i32_1 = arith.constant 0 : i32
    return %c0_i32, %c0_i32_0 : i32, i32
  }
  func.func @transform_3(%arg0: i32, %arg1: i32) -> (i32, i32) {
    %c0_i32 = arith.constant 0 : i32
    %c0_i32_0 = arith.constant 0 : i32
    return %c0_i32, %arg1 : i32, i32
  }
  func.func @transform_4(%arg0: i32, %arg1: i32) -> (i32, i32) {
    %c0_i32 = arith.constant 0 : i32
    %c0_i32_0 = arith.constant 0 : i32
    return %c0_i32, %arg1 : i32, i32
  }
  func.func @transform_5(%arg0: i32, %arg1: i32) -> (i32, i32, i32) {
    %c0_i32 = arith.constant 0 : i32
    %c0_i32_0 = arith.constant 0 : i32
    return %arg0, %c0_i32, %arg1 : i32, i32, i32
  }
}

</mosaic_0001>

<bundles_post_ra>
// kernel: tpu_custom_call.1
= control target key start
LH: loop header
LB: loop body
LE: loop exit
PB: predicated region body
PF: predicated region fallthrough
CT: control target
= control target key end

     0   :  { %10 = vsyncpa [#allocation4], 0  ;;  %s1039_s0 = inlined_call_operand.vmem [shape: f32[2,8,32], index: 0, kind: input, shape index: {}]   ;;  %s1040_s1 = inlined_call_operand.vmem [shape: f32[32,35], index: 1, kind: input, shape index: {}]   ;;  %s1041_s2 = inlined_call_operand.vmem [shape: f32[1,35], index: 2, kind: input, shape index: {}]   ;;  %s1042_s3 = inlined_call_operand.vmem [shape: f32[35,32], index: 3, kind: input, shape index: {}]   ;;  %s1043_s4 = inlined_call_operand.vmem [shape: f32[1,32], index: 4, kind: input, shape index: {}]   ;;  %s1044_s5 = inlined_call_operand.hbm [shape: f32[2,8,32], index: 5, kind: output, shape index: {}]  }
   0x1   :  { %12 = vsyncpa [#allocation4 + $0x1], 0  ;;  %s892_s18 = smov 0   ;;  %s894_s19 = smov 0  }
   0x2   :  { %s896_s20 = smov 0   ;;  %s898_s21 = smov 0  }
   0x3   :  { %s900_s22 = smov 0   ;;  %s902_s23 = smov 0  }
   0x4 LB: > { %s635_s24 = sadd.s32 4294967295, %s852_s23   ;;  %s636_s25 = sadd.s32 4294967294, %s852_s23   ;;  %s852_s23 = sphi %s902_s23, %s18_s23   ;;  %s848_s22 = sphi %s900_s22, %s1051_s22   ;;  %s844_s21 = sphi %s898_s21, %s1050_s21   ;;  %s840_s20 = sphi %s896_s20, %s1049_s20   ;;  %s836_s19 = sphi %s894_s19, %s1048_s19   ;;  %s832_s18 = sphi %s892_s18, %s1047_s18  }
   0x5   : > { %s30_s26 = sadd.s32 1, %s848_s22  ;;  %s159_s27 = sadd.s32 1, %s840_s20 }
   0x6   : > { %p32_p0 = scmp.ge.s32.totalorder %s30_s26, 2  ;;  %p169_p1 = scmp.ne.s32.totalorder %s840_s20, %s836_s19 }
   0x7   : > { %p170_p2 = scmp.eq.s32.totalorder %s635_s24, 1  ;;  %p175_p3 = scmp.ne.s32.totalorder %s836_s19, %s832_s18 }
   0x8   : > { %s1053_s26 = smov (%p32_p0, %s30_s26), 0  ;;  %p176_p5 = scmp.eq.s32.totalorder %s636_s25, 1 }
   0x9   : > { %p932_p4 = por %p170_p2, %p169_p1  ;;  %s154_s29 = ssub.s32 %s848_s22, %s1053_s26 }
   0xa   : > { %p641_p6 = scmp.ge.s32.totalorder %s852_s23, 1  ;;  %p157_p7 = scmp.eq.s32.totalorder %s154_s29, 0 }
   0xb   : > { %p939_p8 = por %p176_p5, %p175_p3  ;;  %p220_p9 = scmp.lt.s32.totalorder %s852_s23, 3 }
   0xc   : > { %s945_s6 = scalar_select %p157_p7, %s840_s20, %s159_s27  }
   0xd   : > { %p221_p10 = pnand %p641_p6, %p220_p9 }
   0xe   : > { %v270_v0 = vld [vmem:[%s1040_s1] sm:$0xff] (!%p221_p10)  ;;  %v271_v1 = vld [vmem:[%s1040_s1 + $0x8] sm:$0xff] (!%p221_p10)  ;;  %v272_v2 = vld [vmem:[%s1040_s1 + $0x10] sm:$0xff] (!%p221_p10)  ;;  %v854_v3 = vmov (!%p221_p10), 0.0|0.0   ;;  %vm855_vm0 = vmmov (!%p221_p10), 0   ;;  %v856_v6 = vmov (!%p221_p10), 0.0   ;;  %v409_v47 = vlaneseq (!%p221_p10) }
   0xf   : > { %224 = sbr.rel (%p221_p10) target bundleno = 1048 (0x418), region = 40  ;;  %688 = vmatprep.subr.bf16.mxu0 (!%p221_p10), %v854_v3  ;;  %v689_v4 = vpack.c.bf16 (!%p221_p10), %v271_v1, %v270_v0  ;;  %v273_v5 = vld [vmem:[%s1040_s1 + $0x18] sm:$0xff] (!%p221_p10)  ;;  %672 = vmatprep.mubr.msk.f32.mxu0 (!%p221_p10), %vm855_vm0, %v856_v6  ;;  %p254_p11 = scmp.lt.s32.totalorder (!%p221_p10), %s844_s21, 1  ;;  %vm281_vm1 = vcmask (!%p221_p10), 261120   ;;  %v644_v9 = vld [vmem:[%s1041_s2] ss:$0 sm:$0xff] (!%p221_p10) }
  0x10   : > { %694 = vmatprep.subr.bf16.mxu1 (!%p221_p10), %v854_v3  ;;  %685 = vmatprep.mubr.msk.f32.mxu1 (!%p221_p10), %vm855_vm0, %v856_v6  ;;  %v692_v7 = vpack.c.bf16 (!%p221_p10), %v273_v5, %v272_v2  ;;  %vm361_vm2 = vcmask (!%p221_p10), 285952   ;;  %s857_s7 = smov (!%p221_p10), 96   ;;  %vm372_vm3 = vcmask (!%p221_p10), 23552   ;;  %v858_v20 = vmov (!%p221_p10), 32   ;;  %v433_v26 = vld [vmem:[%s1042_s3] sm:$0xff] (!%p221_p10)  ;;  %v434_v27 = vld [vmem:[%s1042_s3 + $0x8] sm:$0xff] (!%p221_p10) }
  0x11   : > { %690 = vmatpush3.bf16.msra.mxu0 (!%p221_p10), %v689_v4  ;;  %762 = vset.pattern.permute.xlu1 (!%p221_p10), %v858_v20  ;;  %v859_v21 = vmov (!%p221_p10), 34   ;;  %v860_v25 = vmov (!%p221_p10), 33   ;;  %v695_v28 = vpack.c.bf16 (!%p221_p10), %v434_v27, %v433_v26  ;;  %v435_v29 = vld [vmem:[%s1042_s3 + $0x10] sm:$0xff] (!%p221_p10)  ;;  %v436_v30 = vld [vmem:[%s1042_s3 + $0x18] sm:$0xff] (!%p221_p10)  ;;  %v437_v32 = vld [vmem:[%s1042_s3 + $0x20] sm:$0x7] (!%p221_p10) }
  0x12   : > { %691 = vmatprep.subr.bf16.mxu0 (!%p221_p10), %v854_v3  ;;  %765 = vset.pattern.permute.xlu0 (!%p221_p10), %v859_v21  ;;  %v698_v31 = vpack.c.bf16 (!%p221_p10), %v436_v30, %v435_v29  ;;  %vm449_vm4 = vcmask (!%p221_p10), 1042432   ;;  %v410_v50 = vshrl.u32 (!%p221_p10), %v409_v47, 7  ;;  %vm430_vm5 = vcmask (!%p221_p10), 285696   ;;  %s251_s24 = sand.u32 (!%p221_p10), 1, %s836_s19   ;;  %v646_v2 = vld [vmem:[%s1043_s4] ss:$0 sm:$0xff] (!%p221_p10) }
  0x13   : > { %696 = vmatpush3.bf16.msra.mxu1 (!%p221_p10), %v695_v28  ;;  %s526_s13 = scalar_lea.sflag (!%p221_p10), [#allocation4], %s251_s24 }
  0x14   : > { %697 = vmatprep.subr.bf16.mxu1 (!%p221_p10), %v854_v3  ;;  %v411_v54 = vsub.s32 (!%p221_p10), 0, %v410_v50 }
  0x15   : > { %693 = vmatpush3.bf16.msra.mxu0 (!%p221_p10), %v692_v7 }
  0x16   : > { %s255_s15 = scalar_select %p254_p11, %s844_s21, 1 }
  0x17   : > { %699 = vmatpush3.bf16.msra.mxu1 %v698_v31 }
  0x18   : > { %s643_s16 = sshll.u32 %s255_s15, 3  ;;  %683 = vmatprep.subr.mxu1 %v856_v6 }
  0x19   : > { %s257_s25 = scalar_lea.vmem %s1039_s0, %s643_s16 }
  0x1a   : > { %v269_v8 = vld [vmem:[%s257_s25] sm:$0xff]  ;;  %s642_s25 = sshll.u32 %s251_s24, 3 }
  0x1b   : > { %673 = vmatmul.mubr.msk.f32.vlgmr.msra.gmra.mrb[0].mxu0 %vm281_vm1, %v269_v8  ;;  %684 = vmatpush3.msk.msra.mxu1 %vm449_vm4, %v437_v32  ;;  %s253_s8 = scalar_lea.vmem [#allocation3], %s642_s25 }
  0x1c   : > { %s540_s9 = sshll.u32 %s253_s8, 4  ;;  %s993_s9 = int_to_ptr.vmem [resolvable:$true] %s540_s9 }
  0x1d   : > { %s774_s14 = scalar_lea.vmem %s993_s9, 128 }
  0x1e   : > { %p775_p12 = scmp.ne.s32.totalorder %s993_s9, %s774_s14 }
  0x20   : > { %p776_p13 = pnand %p775_p12, %p932_p4 }
  0x22   : > { %p777_p0 = pneg %p776_p13 }
  0xee   : > { %v351_v10 = vpop.f32.mrb[0].mxu0 }
  0xef   : > { %v352_v11 = vadd.f32 %v644_v9, %v351_v10  ;;  %v674_v12 = vpop.f32.mrb[1].mxu0 }
  0xf1   : > { %v362_v13 = vsel %vm361_vm2, %v352_v11, -inf  ;;  %v355_v33 = vsub.f32 0.0, %v352_v11 }
  0xf2   : > { %363 = vmax.xlane.f32.xlu0 %v362_v13 }
  0xf3   : > { %v356_v34 = vmul.f32 1.442695, %v355_v33 }
 0x17f   : > { %v364_v14 = vpop.xlane.xlu0 %363 }
 0x180   : > { %v365_v15 = vsub.f32 %v352_v11, %v364_v14 }
 0x182   : > { %v366_v16 = vmul.f32 1.442695, %v365_v15 }
 0x184   : > { %766 = vpow2.f32 %v366_v16 }
 0x18e   : > { %v767_v17 = vpop.eup %766 }
 0x18f   : > { %369 = vrot.lane.b32.xlu0 %v767_v17, %s857_s7  ;;  %s650_s7 = sshll.u32 %s844_s21, 7  ;;  %s861_s21 = smov [#allocation3]  }
 0x190   : > { %s991_s12 = scalar_lea.hbm %s1044_s5, %s650_s7  ;;  %s778_s15 = sshll.u32 %s861_s21, 4  ;;  %s779_s15 = int_to_ptr.vmem [resolvable:$false] %s778_s15 }
 0x191   : > { %s780_s16 = scalar_lea.vmem %s779_s15, 256  ;;  %p781_p1 = scmp.lt.s32.totalorder %s993_s9, %s779_s15 }
 0x192   : > { %p782_p2 = scmp.lt.s32.totalorder %s780_s16, %s774_s14 }
 0x194   : > { %p783_p3 = por %p782_p2, %p781_p1 }
 0x196   : > { %p784_p5 = pnand %p783_p3, %p777_p0 }
 0x201   : > { %v370_v18 = vpop.permute.xlu0 %369 }
 0x202   : > { %v373_v19 = vsel %vm372_vm3, %v370_v18, 0.0 }
 0x203   : > { %374 = vadd.xlane.f32.xlu1 %v373_v19 }
 0x290   : > { %v375_v22 = vpop.xlane.xlu1 %374 }
 0x291   : > { %768 = vrcp.f32 %v375_v22 }
 0x292   : > { %770 = vpow2.f32 %v356_v34 }
 0x29b   : > { %v769_v23 = vpop.eup %768 }
 0x29c   : > { %v377_v24 = vmul.f32 %v769_v23, %v767_v17  ;;  %v771_v35 = vpop.eup %770 }
 0x29d   : > { %v358_v36 = vadd.f32 1.0, %v771_v35 }
 0x29e   : > { %406 = vperm.xlu1 %762, %v377_v24  }
 0x29f   : > { %772 = vrcp.f32 %v358_v36 }
 0x2a2   : > { %763 = vset.pattern.permute.xlu1 %v860_v25 }
 0x2a3   : > { %415 = vperm.xlu1 %763, %v377_v24  }
 0x2a7   : > { %764 = vset.pattern.permute.xlu1 %v859_v21 }
 0x2a8   : > { %425 = vperm.xlu1 %764, %v377_v24  }
 0x2a9   : > { %v773_v37 = vpop.eup %772 }
 0x2aa   : > { %v390_v38 = vsub.f32 1.0, %v773_v37  ;;  %v379_v41 = vrot.slane %v773_v37, 4 }
 0x2ac   : > { %v392_v39 = vrot.slane %v390_v38, 4  ;;  %v381_v43 = vmul.f32 %v773_v37, %v379_v41 }
 0x2ae   : > { %v394_v40 = vmul.f32 %v392_v39, %v390_v38  ;;  %v383_v45 = vrot.slane %v381_v43, 2 }
 0x2b0   : > { %v396_v42 = vrot.slane %v394_v40, 2  ;;  %v385_v48 = vmul.f32 %v383_v45, %v381_v43 }
 0x2b2   : > { %v398_v44 = vmul.f32 %v396_v42, %v394_v40  ;;  %v387_v51 = vrot.slane %v385_v48, 1 }
 0x2b4   : > { %v400_v46 = vrot.slane %v398_v44, 1  ;;  %v389_v55 = vmul.f32 %v387_v51, %v385_v48 }
 0x2b6   : > { %v402_v49 = vmul.f32 %v400_v46, %v398_v44  ;;  %v412_v58 = vrot.slane %v389_v55, %v411_v54 }
 0x2b8   : > { %v403_v53 = vsub.f32 1.0, %v402_v49 }
 0x2ba   : > { %v421_v57 = vrot.slane %v403_v53, %v411_v54 }
 0x31d   : > { %v407_v52 = vpop.permute.xlu1 %406 }
 0x31e   : > { %v413_v60 = vmul.f32 %v412_v58, %v407_v52 }
 0x322   : > { %v416_v56 = vpop.permute.xlu1 %415 }
 0x323   : > { %v422_v59 = vmul.f32 %v421_v57, %v416_v56 }
 0x325   : > { %v423_v62 = vadd.f32 %v422_v59, %v413_v60 }
 0x327   : > { %v426_v61 = vpop.permute.xlu1 %425 }
 0x328   : > { %v428_v63 = vmul.f32 %v426_v61, %v390_v38 }
 0x32a   : > { %v429_v0 = vadd.f32 %v428_v63, %v423_v62 }
 0x32c   : > { %431 = vst.msk [vmem:[#allocation2] sm:$0xff] %vm430_vm5, %v429_v0 }
 0x333   : > { %v432_v1 = vld [vmem:[#allocation2] sm:$0xff] }
 0x334   : > { %686 = vmatmul.mubr.msk.f32.vlgmr.msra.gmra.mrb[0].mxu1 %vm430_vm5, %v432_v1 }
 0x407   : > { %v519_v3 = vpop.f32.mrb[0].mxu1 }
 0x408   : > { %v520_v4 = vadd.f32 %v646_v2, %v519_v3  ;;  %v687_v5 = vpop.f32.mrb[1].mxu1 }
 0x40a   : > { %524 = vst.msk [vmem:[%s253_s8] sm:$0xff] %vm281_vm1, %v520_v4 }
 0x40b   : > { %787 = shalt.err (!%p784_p5)
}
 0x40c   : > { %s788_s17 = scalar_lea.hbm %s991_s12, 128  ;;  %s792_s27 = scalar_lea.hbm %s1044_s5, 256 }
 0x40d   : > { %p789_p6 = scmp.ne.s32.totalorder %s991_s12, %s788_s17  ;;  %p793_p10 = scmp.lt.u32.totalorder %s991_s12, %s1044_s5 }
 0x40e   : > { %p794_p11 = scmp.lt.u32.totalorder %s792_s27, %s788_s17  ;;  %p796_p13 = scmp.lt.u32.totalorder %s788_s17, %s991_s12 }
 0x40f   : > { %p790_p7 = pnand %p789_p6, %p932_p4 }
 0x410   : > { %p795_p12 = por %p794_p11, %p793_p10 }
 0x411   : > { %p791_p9 = pneg %p790_p7 }
 0x412   : > { %p797_p0 = por %p796_p13, %p795_p12 }
 0x414   : > { %p798_p1 = pnand %p797_p0, %p791_p9 }
 0x416   : > { %801 = shalt.err (!%p798_p1)
}
 0x417   : > { %700 = dma.vmem_to_hbm [thread:$0]  (%p932_p4), %s993_s9, 128, %s991_s12, %s526_s13  }
 0x418 PF: > { %p706_p2 = scmp.ge.s32.totalorder %s852_s23, 2  ;;  %s552_s8 = sand.u32 1, %s832_s18  }
 0x419   : > { %s553_s10 = scalar_lea.sflag [#allocation4], %s552_s8 }
 0x41a   : > { %p703_p3 = pnand %p706_p2, %p939_p8 }
 0x41c   : > { %827 = dma.done.wait (!%p703_p3), %s553_s10, 128  }
 0x41d   : > { %829 = vsyncadd (!%p703_p3), %s553_s10, 4294967168  ;;  %s18_s23 = sadd.s32 1, %s852_s23   ;;  %s1047_s18 = smov %s836_s19 }
 0x41e   : > { %p15_p5 = scmp.ge.s32.totalorder %s18_s23, 4   ;;  %s1048_s19 = smov %s840_s20 }
 0x41f   : > { %s1049_s20 = smov %s945_s6  ;;  %s1050_s21 = smov %s848_s22 }
 0x420   : > { %s1051_s22 = smov %s1053_s26  ;;  %17 = sbr.rel (!%p15_p5) target bundleno = 4 (0x4), region = 85 }
 0x427   :  { %558 = vsyncpa [#allocation4], 1 }
 0x428   :  { %560 = vsyncpa [#allocation4 + $0x1], 1 }

</bundles_post_ra>
